<compile_context>
chip_gen: v7x
topology: tpu7x:2x2x1
jax: 0.10.0
libtpu: 0.0.40
codegen_flags: <defaults>
</compile_context>

<pallas_src>
import functools
import math

import numpy as np

import jax
import jax.numpy as jnp
from jax.experimental import pallas as pl
from jax.experimental.pallas import tpu as pltpu


# Per-grid-step VMEM budget for the gridded copy path (double-buffered
# inputs + output); kept well under v7x's 64 MiB physical VMEM.
_VMEM_STEP_BUDGET = 20 * 1024 * 1024
# Scoped-VMEM limit for the gridded path: above the 16/32 MiB defaults so big
# tiles compile on v5e/v6e, comfortably below v7x's 64 MiB physical VMEM.
_VMEM_LIMIT_BYTES = 48 * 1024 * 1024
# Below this per-destination-row contiguous chunk, strided HBM->HBM DMA falls
# off the roofline (descriptor/burst overhead) -> use the VMEM path instead.
_MIN_DMA_CHUNK_BYTES = 512


def _dma_concat_kernel(offsets, widths, *refs):
    """Pure HBM->HBM concat: one overlapped async DMA per input.

    refs = (*in_hbm_refs, out_hbm_ref, sem_array).  Inputs are 2-D
    (pre, width_i); output is (pre, sum(widths)).  offsets/widths are static
    Python ints; zero-width inputs are filtered out by the wrapper.
    """
    n = len(widths)
    in_refs = refs[:n]
    out_ref = refs[n]
    sems = refs[n + 1]

    copies = []
    for i, (src, off, w) in enumerate(zip(in_refs, offsets, widths)):
        cp = pltpu.make_async_copy(src, out_ref.at[:, pl.ds(off, w)], sems.at[i])
        cp.start()
        copies.append(cp)
    for cp in copies:
        cp.wait()


def _vmem_concat_kernel(offsets, widths, *refs):
    """Gridded VMEM copy; dtype cast fused into wide, lane-dense stores."""
    n = len(widths)
    in_refs = refs[:n]
    out_ref = refs[n]          # VMEM block (tile_pre, sum(widths))
    for src, off, w in zip(in_refs, offsets, widths):
        # Static lane-axis slice: when post % 128 == 0 every offset is
        # 128-aligned, so these are unmasked wide stores.
        out_ref[:, off:off + w] = src[...].astype(out_ref.dtype)


def _choose_tile_pre(pre, row_bytes):
    """Pre-axis tile: multiple of 8 (or the full axis), within the VMEM
    budget, and (when possible) giving >= 2 grid steps for v7x megacore."""
    max_tile = max(1, _VMEM_STEP_BUDGET // max(1, 2 * row_bytes))
    if pre <= 8:
        # Sub-8 sublane tiles must equal the full axis (8,128 block rule).
        # TODO(synk): tile the lane (post) axis instead so a tiny `pre`
        # still yields >= 2 parallel steps for v7x's two TensorCores.
        return pre
    tile = max(8, (min(pre, max_tile) // 8) * 8)
    # Prefer at least two grid steps so a megacore can split the copy.
    half = max(8, ((pre // 2) // 8) * 8)
    return min(tile, half)


def pallas_concat(xs, dimension=1):
    """JAX/Pallas equivalent of Concat(dimension).forward(xs)."""
    xs = list(xs)
    assert len(xs) >= 1
    ndim = xs[0].ndim
    axis = dimension % ndim

    # NOTE: jnp.result_type may differ from torch promotion for exotic
    # int/float mixes; uniform-dtype inputs (the common case) are unaffected.
    out_dtype = jnp.result_type(*[x.dtype for x in xs])
    out_itemsize = np.dtype(out_dtype).itemsize

    sizes_all = [int(x.shape[axis]) for x in xs]
    total = sum(sizes_all)
    out_full_shape = list(xs[0].shape)
    out_full_shape[axis] = total
    out_full_shape = tuple(out_full_shape)

    # Drop zero-width inputs (torch.cat allows them; they contribute nothing).
    kept = [(x, c) for x, c in zip(xs, sizes_all) if c > 0]
    if not kept:
        return jnp.zeros(out_full_shape, out_dtype)
    if len(kept) == 1:
        return kept[0][0].astype(out_dtype).reshape(out_full_shape)
    xs = [x for x, _ in kept]
    sizes = [c for _, c in kept]

    # Collapse to a canonical 2-D (pre, concat*post) view (free relabel).
    pre = int(math.prod(xs[0].shape[:axis]))
    post = int(math.prod(xs[0].shape[axis + 1:]))
    widths = [c * post for c in sizes]
    offsets, acc = [], 0
    for w in widths:
        offsets.append(acc)
        acc += w
    total_w = total * post
    xs2 = [x.reshape(pre, w) for x, w in zip(xs, widths)]

    # Mixed-dtype dispatch: if off-dtype inputs are a small byte fraction,
    # cast just those up front and take the pure-DMA fast path.
    odd = [i for i, x in enumerate(xs2) if x.dtype != out_dtype]
    if odd:
        odd_bytes = sum(xs2[i].size * xs2[i].dtype.itemsize for i in odd)
        all_bytes = sum(x.size * x.dtype.itemsize for x in xs2)
        if odd_bytes * 4 < all_bytes:
            odd_set = set(odd)
            xs2 = [x.astype(out_dtype) if i in odd_set else x
                   for i, x in enumerate(xs2)]
            odd = []
    same_dtype = not odd

    # Per-destination-row contiguous chunk size (bytes) of the smallest input.
    min_chunk_bytes = min(w * x.dtype.itemsize for x, w in zip(xs2, widths))
    # Per-pre-row VMEM footprint (all inputs + output) for the gridded path.
    row_bytes = (sum(w * x.dtype.itemsize for x, w in zip(xs2, widths))
                 + total_w * out_itemsize)

    use_dma = same_dtype and (pre == 1 or min_chunk_bytes >= _MIN_DMA_CHUNK_BYTES)
    if not use_dma and 2 * row_bytes * min(pre, 8) > _VMEM_STEP_BUDGET:
        # A single flattened row is too wide for a safe VMEM tile.
        # TODO(synk): tile the lane axis of the gridded path instead of
        # falling back to cast + DMA here.
        xs2 = [x.astype(out_dtype) for x in xs2]
        use_dma = True

    if use_dma:
        # Fast path: overlapped HBM->HBM DMAs, no VMEM staging, no grid.
        bytes_accessed = 2 * pre * total_w * out_itemsize
        out2 = pl.pallas_call(
            functools.partial(_dma_concat_kernel, offsets, widths),
            out_shape=jax.ShapeDtypeStruct((pre, total_w), out_dtype),
            in_specs=[pl.BlockSpec(memory_space=pl.ANY) for _ in xs2],
            out_specs=pl.BlockSpec(memory_space=pl.ANY),
            scratch_shapes=[pltpu.SemaphoreType.DMA((len(xs2),))],
            compiler_params=pltpu.CompilerParams(has_side_effects=True),
            cost_estimate=pl.CostEstimate(
                flops=0, transcendentals=0, bytes_accessed=bytes_accessed),
        )(*xs2)
    else:
        # Gridded VMEM copy: big lane-dense blocks over the pre axis; any
        # dtype cast rides for free on the memory-bound copy.
        tile_pre = _choose_tile_pre(pre, row_bytes)
        grid = (pl.cdiv(pre, tile_pre),)
        out2 = pl.pallas_call(
            functools.partial(_vmem_concat_kernel, offsets, widths),
            out_shape=jax.ShapeDtypeStruct((pre, total_w), out_dtype),
            grid=grid,
            in_specs=[pl.BlockSpec((tile_pre, w), lambda p: (p, 0))
                      for w in widths],
            out_specs=pl.BlockSpec((tile_pre, total_w), lambda p: (p, 0)),
            compiler_params=pltpu.CompilerParams(
                dimension_semantics=("parallel",),
                vmem_limit_bytes=_VMEM_LIMIT_BYTES),
        )(*xs2)

    return out2.reshape(out_full_shape)


if __name__ == "__main__":
    key = jax.random.PRNGKey(0)
    k1, k2, k3, k4, k5, k6 = jax.random.split(key, 6)

    # NCHW inputs with differing channel counts (concat along dim=1).
    x1 = jax.random.normal(k1, (2, 4, 16, 16), dtype=jnp.float32)
    x2 = jax.random.normal(k2, (2, 6, 16, 16), dtype=jnp.float32)
    x3 = jax.random.normal(k3, (2, 2, 16, 16), dtype=jnp.float32)

    # 1) Uniform dtype -> overlapped HBM->HBM DMA path.
    out = jax.block_until_ready(pallas_concat([x1, x2, x3], dimension=1))
    ref = jnp.concatenate([x1, x2, x3], axis=1)
    assert out.shape == ref.shape and out.dtype == ref.dtype
    assert jnp.array_equal(out, ref), "DMA concat mismatch"

    # 2) Mixed dtype, comparable byte fractions -> gridded VMEM path with the
    #    bf16->f32 cast fused into lane-dense stores.
    x4 = jax.random.normal(k4, (2, 3, 16, 16), dtype=jnp.bfloat16)
    out2 = jax.block_until_ready(pallas_concat([x1, x4], dimension=1))
    ref2 = jnp.concatenate([x1, x4], axis=1)
    assert out2.shape == ref2.shape and out2.dtype == ref2.dtype
    assert jnp.array_equal(out2, ref2), "mixed-dtype concat mismatch"

    # 3) Mixed dtype where the odd input is a small byte fraction -> cast it
    #    up front and take the DMA fast path.
    x5 = jax.random.normal(k5, (2, 12, 16, 16), dtype=jnp.float32)
    x6 = jax.random.normal(k6, (2, 1, 16, 16), dtype=jnp.bfloat16)
    out3 = jax.block_until_ready(pallas_concat([x5, x6], dimension=1))
    ref3 = jnp.concatenate([x5, x6.astype(jnp.float32)], axis=1)
    assert out3.shape == ref3.shape and out3.dtype == ref3.dtype
    assert jnp.array_equal(out3, ref3), "cast+DMA concat mismatch"

    # 4) Last-axis concat with tiny contiguous chunks -> tiled VMEM copy path
    #    (exercises tile_pre > 8, the multi-step parallel grid, and the
    #    small-chunk DMA guard).
    y1 = jax.random.normal(k1, (2, 4, 16, 16), dtype=jnp.float32)
    y2 = jax.random.normal(k2, (2, 4, 16, 8), dtype=jnp.float32)
    out4 = jax.block_until_ready(pallas_concat([y1, y2], dimension=3))
    ref4 = jnp.concatenate([y1, y2], axis=3)
    assert out4.shape == ref4.shape and out4.dtype == ref4.dtype
    assert jnp.array_equal(out4, ref4), "last-axis concat mismatch"

    print("KERNEL_OK")
</pallas_src>

<mosaic_0001>
module attributes {stable_mosaic.version = 11 : i64} {
  func.func @_dma_concat_kernel(%arg0: memref<2x1024xf32, #tpu.memory_space<any>>, %arg1: memref<2x1536xf32, #tpu.memory_space<any>>, %arg2: memref<2x512xf32, #tpu.memory_space<any>>, %arg3: memref<2x3072xf32, #tpu.memory_space<any>>, %arg4: memref<3x!tpu.dma_semaphore, #tpu.memory_space<semaphore_mem>>) attributes {dimension_semantics = [], scalar_prefetch = 0 : i64, scratch_operands = 1 : i64, tpu.core_type = #tpu.core_type<tc>} {
    %c0_i32 = arith.constant 0 : i32
    %c0_i32_0 = arith.constant 0 : i32
    %c0_i32_1 = arith.constant 0 : i32
    %0 = tpu.memref_slice %arg3[%c0_i32_0, %c0_i32_1] : memref<2x3072xf32, #tpu.memory_space<any>> -> memref<2x1024xf32, #tpu.memory_space<any>>
    %1 = tpu.memref_slice %arg4[%c0_i32] : memref<3x!tpu.dma_semaphore, #tpu.memory_space<semaphore_mem>> -> memref<1x!tpu.dma_semaphore, #tpu.memory_space<semaphore_mem>>
    %2 = tpu.memref_squeeze %1 : memref<1x!tpu.dma_semaphore, #tpu.memory_space<semaphore_mem>> -> memref<!tpu.dma_semaphore, #tpu.memory_space<semaphore_mem>>
    tpu.enqueue_dma source(%arg0 : memref<2x1024xf32, #tpu.memory_space<any>>) target(%0 : memref<2x1024xf32, #tpu.memory_space<any>>) target_semaphore(%2 : memref<!tpu.dma_semaphore, #tpu.memory_space<semaphore_mem>>)
    %c1_i32 = arith.constant 1 : i32
    %c0_i32_2 = arith.constant 0 : i32
    %c1024_i32 = arith.constant 1024 : i32
    %3 = tpu.memref_slice %arg3[%c0_i32_2, %c1024_i32] : memref<2x3072xf32, #tpu.memory_space<any>> -> memref<2x1536xf32, #tpu.memory_space<any>>
    %4 = tpu.memref_slice %arg4[%c1_i32] : memref<3x!tpu.dma_semaphore, #tpu.memory_space<semaphore_mem>> -> memref<1x!tpu.dma_semaphore, #tpu.memory_space<semaphore_mem>>
    %5 = tpu.memref_squeeze %4 : memref<1x!tpu.dma_semaphore, #tpu.memory_space<semaphore_mem>> -> memref<!tpu.dma_semaphore, #tpu.memory_space<semaphore_mem>>
    tpu.enqueue_dma source(%arg1 : memref<2x1536xf32, #tpu.memory_space<any>>) target(%3 : memref<2x1536xf32, #tpu.memory_space<any>>) target_semaphore(%5 : memref<!tpu.dma_semaphore, #tpu.memory_space<semaphore_mem>>)
    %c2_i32 = arith.constant 2 : i32
    %c0_i32_3 = arith.constant 0 : i32
    %c2560_i32 = arith.constant 2560 : i32
    %6 = tpu.memref_slice %arg3[%c0_i32_3, %c2560_i32] : memref<2x3072xf32, #tpu.memory_space<any>> -> memref<2x512xf32, #tpu.memory_space<any>>
    %7 = tpu.memref_slice %arg4[%c2_i32] : memref<3x!tpu.dma_semaphore, #tpu.memory_space<semaphore_mem>> -> memref<1x!tpu.dma_semaphore, #tpu.memory_space<semaphore_mem>>
    %8 = tpu.memref_squeeze %7 : memref<1x!tpu.dma_semaphore, #tpu.memory_space<semaphore_mem>> -> memref<!tpu.dma_semaphore, #tpu.memory_space<semaphore_mem>>
    tpu.enqueue_dma source(%arg2 : memref<2x512xf32, #tpu.memory_space<any>>) target(%6 : memref<2x512xf32, #tpu.memory_space<any>>) target_semaphore(%8 : memref<!tpu.dma_semaphore, #tpu.memory_space<semaphore_mem>>)
    %c0_i32_4 = arith.constant 0 : i32
    %c0_i32_5 = arith.constant 0 : i32
    %c0_i32_6 = arith.constant 0 : i32
    %9 = tpu.memref_slice %arg3[%c0_i32_5, %c0_i32_6] : memref<2x3072xf32, #tpu.memory_space<any>> -> memref<2x1024xf32, #tpu.memory_space<any>>
    %10 = tpu.memref_slice %arg4[%c0_i32_4] : memref<3x!tpu.dma_semaphore, #tpu.memory_space<semaphore_mem>> -> memref<1x!tpu.dma_semaphore, #tpu.memory_space<semaphore_mem>>
    %11 = tpu.memref_squeeze %10 : memref<1x!tpu.dma_semaphore, #tpu.memory_space<semaphore_mem>> -> memref<!tpu.dma_semaphore, #tpu.memory_space<semaphore_mem>>
    tpu.wait_dma2 semaphore(%11 : memref<!tpu.dma_semaphore, #tpu.memory_space<semaphore_mem>>) src(%arg0 : memref<2x1024xf32, #tpu.memory_space<any>>) dst(%9 : memref<2x1024xf32, #tpu.memory_space<any>>)
    %c1_i32_7 = arith.constant 1 : i32
    %c0_i32_8 = arith.constant 0 : i32
    %c1024_i32_9 = arith.constant 1024 : i32
    %12 = tpu.memref_slice %arg3[%c0_i32_8, %c1024_i32_9] : memref<2x3072xf32, #tpu.memory_space<any>> -> memref<2x1536xf32, #tpu.memory_space<any>>
    %13 = tpu.memref_slice %arg4[%c1_i32_7] : memref<3x!tpu.dma_semaphore, #tpu.memory_space<semaphore_mem>> -> memref<1x!tpu.dma_semaphore, #tpu.memory_space<semaphore_mem>>
    %14 = tpu.memref_squeeze %13 : memref<1x!tpu.dma_semaphore, #tpu.memory_space<semaphore_mem>> -> memref<!tpu.dma_semaphore, #tpu.memory_space<semaphore_mem>>
    tpu.wait_dma2 semaphore(%14 : memref<!tpu.dma_semaphore, #tpu.memory_space<semaphore_mem>>) src(%arg1 : memref<2x1536xf32, #tpu.memory_space<any>>) dst(%12 : memref<2x1536xf32, #tpu.memory_space<any>>)
    %c2_i32_10 = arith.constant 2 : i32
    %c0_i32_11 = arith.constant 0 : i32
    %c2560_i32_12 = arith.constant 2560 : i32
    %15 = tpu.memref_slice %arg3[%c0_i32_11, %c2560_i32_12] : memref<2x3072xf32, #tpu.memory_space<any>> -> memref<2x512xf32, #tpu.memory_space<any>>
    %16 = tpu.memref_slice %arg4[%c2_i32_10] : memref<3x!tpu.dma_semaphore, #tpu.memory_space<semaphore_mem>> -> memref<1x!tpu.dma_semaphore, #tpu.memory_space<semaphore_mem>>
    %17 = tpu.memref_squeeze %16 : memref<1x!tpu.dma_semaphore, #tpu.memory_space<semaphore_mem>> -> memref<!tpu.dma_semaphore, #tpu.memory_space<semaphore_mem>>
    tpu.wait_dma2 semaphore(%17 : memref<!tpu.dma_semaphore, #tpu.memory_space<semaphore_mem>>) src(%arg2 : memref<2x512xf32, #tpu.memory_space<any>>) dst(%15 : memref<2x512xf32, #tpu.memory_space<any>>)
    return
  }
}

</mosaic_0001>

<bundles_post_ra>
// kernel: tpu_custom_call.1
= control target key start
LH: loop header
LB: loop body
LE: loop exit
PB: predicated region body
PF: predicated region fallthrough
CT: control target
= control target key end

     0   :  { %s97_s15 = smov [#allocation2]   ;;  %s98_s16 = smov [#allocation3]   ;;  %s142_s0 = inlined_call_operand.hbm [shape: f32[2,1024], index: 0, kind: input, shape index: {}]   ;;  %s143_s3 = inlined_call_operand.hbm [shape: f32[2,3072], index: 3, kind: output, shape index: {}]   ;;  %s144_s1 = inlined_call_operand.hbm [shape: f32[2,1536], index: 1, kind: input, shape index: {}]   ;;  %s145_s2 = inlined_call_operand.hbm [shape: f32[2,512], index: 2, kind: input, shape index: {}]  }
   0x1   :  { %s21_s14 = scalar_lea.hbm %s143_s3, 256  ;;  %s99_s17 = smov 0  }
   0x2   :  { %20 = dma.general %s142_s0, 256, %s143_s3, %s97_s15, %s98_s16, [#allocation4], %s99_s17, 0  }
   0x3   :  { %s36_s24 = scalar_lea.hbm %s143_s3, 640  ;;  %s100_s25 = smov [#allocation2 + $0x1]  }
   0x4   :  { %s101_s26 = smov [#allocation5]   ;;  %s102_s29 = smov [#allocation2 + $0x2]  }
   0x5   :  { %35 = dma.general %s144_s1, 384, %s21_s14, %s100_s25, %s101_s26, [#allocation6], %s99_s17, 0  }
   0x6   :  { %s103_s30 = smov [#allocation7]  }
   0x7   :  { %50 = dma.general %s145_s2, 128, %s36_s24, %s102_s29, %s103_s30, [#allocation8], %s99_s17, 0  }
   0x8   :  { %91 = dma.done.wait [#allocation2], 256 }
   0x9   :  { %92 = vsyncadd [#allocation2], 4294967040 }
   0xa   :  { %93 = dma.done.wait [#allocation2 + $0x1], 384 }
   0xb   :  { %94 = vsyncadd [#allocation2 + $0x1], 4294966912 }
   0xc   :  { %95 = dma.done.wait [#allocation2 + $0x2], 128 }
   0xd   :  { %96 = vsyncadd [#allocation2 + $0x2], 4294967168 }
   0xe   :  { %61 = vsyncmov [#allocation2] }
  0x11   :  { %s62_s0 = vpop.sfrf %61 }
  0x12   :  { %p81_p0 = scmp.ne.s32.totalorder %s62_s0, 0 }
  0x14   :  { %66 = shalt.err (%p81_p0)  }
  0x15   :  { %68 = vsyncmov [#allocation2 + $0x1] }
  0x18   :  { %s69_s3 = vpop.sfrf %68 }
  0x19   :  { %p82_p1 = scmp.ne.s32.totalorder %s69_s3, 0 }
  0x1b   :  { %73 = shalt.err (%p82_p1)  }
  0x1c   :  { %75 = vsyncmov [#allocation2 + $0x2] }
  0x1f   :  { %s76_s1 = vpop.sfrf %75 }
  0x20   :  { %p83_p2 = scmp.ne.s32.totalorder %s76_s1, 0 }
  0x22   :  { %80 = shalt.err (%p83_p2)  }

</bundles_post_ra>
